<compile_context>
chip_gen: v7x
topology: tpu7x:2x2x1
jax: 0.10.0
libtpu: 0.0.40
codegen_flags: <defaults>
</compile_context>

<pallas_src>
import functools

import jax
import jax.numpy as jnp
from jax.experimental import pallas as pl
from jax.experimental.pallas import tpu as pltpu

LANES = 128
ACC_ROWS = 8  # one f32 vreg worth of sublanes -> (8, 128) accumulator


def _chip_tuning():
    """Return (row-tile target, dual-TensorCore?) for the current TPU generation."""
    try:
        kind = jax.devices()[0].device_kind.lower()
    except Exception:
        kind = ""
    is_v7 = "v7" in kind
    multi_tc = is_v7 or ("v4" in kind) or ("v5p" in kind)
    # ~1 MiB per f32 input block (TM=2048) is the measured roofline knee on
    # v5e/v6e; v7x (~3.2 TB/s per TC) needs ~2 MiB blocks to amortize the
    # ~0.35us fixed per-grid-step overhead.
    return (4096 if is_v7 else 2048), multi_tc


def _sublane_pack(dtype):
    itemsize = jnp.dtype(dtype).itemsize
    if itemsize >= 4:
        return 8
    if itemsize == 2:
        return 16
    return 32


def _bce_loss_f32(x, t, label_smoothing):
    if label_smoothing > 0.0:
        t = t * (1.0 - label_smoothing) + 0.5 * label_smoothing
    # Numerically stable BCE with logits.
    return jnp.maximum(x, 0.0) - x * t + jnp.log1p(jnp.exp(-jnp.abs(x)))


def _bce_sum_kernel(pred_ref, tgt_ref, out_ref, acc_ref, *,
                    label_smoothing: float, valid_rows: int, tile_rows: int,
                    num_tiles: int, tiles_per_core: int, num_cores: int):
    c = pl.program_id(0)            # chunk / TensorCore axis ("parallel")
    j = pl.program_id(1)            # tile axis within the chunk ("arbitrary")
    last_j = pl.num_programs(1) - 1
    g = c * tiles_per_core + j      # global tile index

    @pl.when(j == 0)
    def _():
        acc_ref[...] = jnp.zeros_like(acc_ref)

    # Cast in-register (free on a mem-bound kernel); inputs stay narrow in HBM.
    x = pred_ref[...].astype(jnp.float32)
    t = tgt_ref[...].astype(jnp.float32)
    loss = _bce_loss_f32(x, t, label_smoothing)

    def accumulate(l):
        # Fold the (tile_rows, 128) tile into the (8, 128) accumulator with
        # sublane-group vreg adds: same add count as a tile-sized accumulator
        # but no tile-sized VMEM read+write per step, and the one-time final
        # cross-lane reduce is tile_rows/8 times smaller.
        acc_ref[...] += l.reshape(tile_rows // ACC_ROWS, ACC_ROWS, LANES).sum(axis=0)

    has_partial = (valid_rows % tile_rows) != 0
    has_phantom = (num_cores * tiles_per_core) > num_tiles  # short core re-reads last tile

    if has_partial or has_phantom:
        # Tiles below `thresh` are guaranteed full & valid; tiles at/above it are
        # either the single ragged tile or the short core's clamped "phantom"
        # tile -- in both cases the row-id SELECT zeroes everything past
        # valid_rows (select, not multiply, so NaN/Inf padding cannot leak in).
        thresh = (num_tiles - 1) if has_partial else num_tiles

        @pl.when(g < thresh)
        def _():
            accumulate(loss)

        @pl.when(g >= thresh)
        def _():
            row_ids = g * tile_rows + jax.lax.broadcasted_iota(
                jnp.int32, (tile_rows, LANES), 0)
            accumulate(jnp.where(row_ids < valid_rows, loss, 0.0))
    else:
        accumulate(loss)

    @pl.when(j == last_j)
    def _():
        out_ref[0, 0] = jnp.sum(acc_ref[...])


def label_smoothing_bce_with_logits_loss(pred, target, label_smoothing: float = 0.0):
    """Mean-reduced BCE-with-logits loss with label smoothing (Pallas TPU kernel)."""
    assert pred.shape == target.shape
    total = int(pred.size)
    ls = float(label_smoothing)

    flat_p = jnp.ravel(pred)   # native dtype; cast happens in-register in the kernel
    flat_t = jnp.ravel(target)

    rows = total // LANES
    rem = total - rows * LANES
    pack = max(_sublane_pack(pred.dtype), _sublane_pack(target.dtype))

    if rows < pack:
        # Input smaller than one packed sublane tile: not worth a kernel launch.
        # TODO(synk): total == 0 divides by zero (NaN), matching PyTorch on empty input.
        loss = _bce_loss_f32(flat_p.astype(jnp.float32), flat_t.astype(jnp.float32), ls)
        return jnp.sum(loss) / jnp.float32(total)

    # Ragged tail (< one 128-lane row): plain jnp, negligible work.
    if rem > 0:
        tail_sum = jnp.sum(_bce_loss_f32(
            flat_p[rows * LANES:].astype(jnp.float32),
            flat_t[rows * LANES:].astype(jnp.float32), ls))
        p2 = flat_p[:rows * LANES].reshape(rows, LANES)
        t2 = flat_t[:rows * LANES].reshape(rows, LANES)
    else:
        tail_sum = jnp.float32(0.0)
        # Free reshape of the original buffer when total % 128 == 0 (no pad, no copy).
        p2 = flat_p.reshape(rows, LANES)
        t2 = flat_t.reshape(rows, LANES)

    tm_target, multi_tc = _chip_tuning()
    # tm: multiple of the packed sublane tile, never larger than the row count.
    tm = min(tm_target, (rows // pack) * pack)
    num_tiles = pl.cdiv(rows, tm)

    # Dual-TensorCore split (v7x/v4/v5p): leading "parallel" grid axis of size 2
    # with per-core partial sums.  Single-TC parts keep a size-1 axis.
    num_cores = 2 if (multi_tc and num_tiles >= 2) else 1
    tiles_per_core = pl.cdiv(num_tiles, num_cores)

    if num_cores * tiles_per_core > num_tiles:
        # Odd tile count on the 2-core split: clamp the short core's phantom
        # tile onto the last real tile (its contribution is masked in-kernel).
        def in_map(c, j):
            return (jnp.minimum(c * tiles_per_core + j, num_tiles - 1), 0)
    else:
        def in_map(c, j):
            return (c * tiles_per_core + j, 0)

    kernel = functools.partial(
        _bce_sum_kernel, label_smoothing=ls, valid_rows=rows, tile_rows=tm,
        num_tiles=num_tiles, tiles_per_core=tiles_per_core, num_cores=num_cores)

    in_bytes = (jnp.dtype(pred.dtype).itemsize
                + jnp.dtype(target.dtype).itemsize) * total
    cost = pl.CostEstimate(flops=10 * total, transcendentals=2 * total,
                           bytes_accessed=in_bytes + 4 * num_cores)

    partials = pl.pallas_call(
        kernel,
        out_shape=jax.ShapeDtypeStruct((num_cores, 1), jnp.float32),
        grid_spec=pltpu.PrefetchScalarGridSpec(
            num_scalar_prefetch=0,
            grid=(num_cores, tiles_per_core),
            in_specs=[
                pl.BlockSpec((tm, LANES), in_map),
                pl.BlockSpec((tm, LANES), in_map),
            ],
            out_specs=pl.BlockSpec((1, 1), lambda c, j: (c, 0),
                                   memory_space=pltpu.SMEM),
            scratch_shapes=[pltpu.VMEM((ACC_ROWS, LANES), jnp.float32)],
        ),
        compiler_params=pltpu.CompilerParams(
            dimension_semantics=("parallel", "arbitrary"),
            vmem_limit_bytes=40 * 1024 * 1024),
        cost_estimate=cost,
    )(p2, t2)

    return (jnp.sum(partials) + tail_sum) / jnp.float32(total)


def _reference(pred, target, label_smoothing):
    return jnp.mean(_bce_loss_f32(pred.astype(jnp.float32),
                                  target.astype(jnp.float32),
                                  float(label_smoothing)))


if __name__ == "__main__":
    key = jax.random.PRNGKey(0)
    k1, k2, k3, k4 = jax.random.split(key, 4)

    # Case 1: NCHW-style segmentation logits (size % 128 == 0 -> pure kernel path).
    shape = (2, 4, 16, 16)
    pred = jax.random.normal(k1, shape, dtype=jnp.float32) * 2.0
    target = (jax.random.uniform(k2, shape) > 0.5).astype(jnp.float32)
    label_smoothing = 0.1

    loss = label_smoothing_bce_with_logits_loss(pred, target, label_smoothing)
    loss = jax.block_until_ready(loss)
    ref = _reference(pred, target, label_smoothing)
    assert jnp.allclose(loss, ref, rtol=1e-5, atol=1e-5), (loss, ref)

    # Case 2: ragged size (exercises masked partial tile + jnp tail path, ls=0).
    shape2 = (3, 5, 7, 11)
    pred2 = jax.random.normal(k3, shape2, dtype=jnp.float32) * 2.0
    target2 = (jax.random.uniform(k4, shape2) > 0.5).astype(jnp.float32)

    loss2 = label_smoothing_bce_with_logits_loss(pred2, target2, 0.0)
    loss2 = jax.block_until_ready(loss2)
    ref2 = _reference(pred2, target2, 0.0)
    assert jnp.allclose(loss2, ref2, rtol=1e-5, atol=1e-5), (loss2, ref2)

    print("KERNEL_OK")
</pallas_src>

<mosaic_0001>
module attributes {stable_mosaic.version = 11 : i64} {
  func.func @_bce_sum_kernel(%arg0: i32, %arg1: i32, %arg2: memref<16x128xf32, #tpu.memory_space<vmem>>, %arg3: memref<16x128xf32, #tpu.memory_space<vmem>>, %arg4: memref<1x1xf32, #tpu.memory_space<smem>>, %arg5: memref<8x128xf32, #tpu.memory_space<vmem>>) attributes {dimension_semantics = [#tpu.dimension_semantics<parallel>, #tpu.dimension_semantics<arbitrary>], iteration_bounds = array<i64: 1, 1>, scalar_prefetch = 0 : i64, scratch_operands = 1 : i64, tpu.core_type = #tpu.core_type<tc>, window_params = [{transform_indices = @transform_0, window_bounds = array<i64: 16, 128>}, {transform_indices = @transform_1, window_bounds = array<i64: 16, 128>}, {transform_indices = @transform_2, window_bounds = array<i64: 1, 1>}]} {
    %c0_i32 = arith.constant 0 : i32
    %0 = arith.cmpi eq, %arg1, %c0_i32 : i32
    %1 = arith.extui %0 : i1 to i32
    %c0_i32_0 = arith.constant 0 : i32
    %2 = arith.cmpi ne, %1, %c0_i32_0 : i32
    scf.if %2 {
      %cst_14 = arith.constant 0.000000e+00 : f32
      %27 = vector.broadcast %cst_14 : f32 to vector<8x128xf32>
      %c0_15 = arith.constant 0 : index
      %c0_16 = arith.constant 0 : index
      %28 = vector.load %arg5[%c0_15, %c0_16] : memref<8x128xf32, #tpu.memory_space<vmem>>, vector<8x128xf32>
      tpu.vector_store %arg5[%c0_15, %c0_16], %27 {strides = array<i32>} : memref<8x128xf32, #tpu.memory_space<vmem>>, vector<8x128xf32>,
    } else {
    }
    %c0 = arith.constant 0 : index
    %c0_1 = arith.constant 0 : index
    %3 = vector.load %arg2[%c0, %c0_1] : memref<16x128xf32, #tpu.memory_space<vmem>>, vector<16x128xf32>
    %c0_2 = arith.constant 0 : index
    %c0_3 = arith.constant 0 : index
    %4 = vector.load %arg3[%c0_2, %c0_3] : memref<16x128xf32, #tpu.memory_space<vmem>>, vector<16x128xf32>
    %cst = arith.constant 0.899999976 : f32
    %5 = vector.broadcast %cst : f32 to vector<16x128xf32>
    %6 = arith.mulf %4, %5 : vector<16x128xf32>
    %cst_4 = arith.constant 5.000000e-02 : f32
    %7 = vector.broadcast %cst_4 : f32 to vector<16x128xf32>
    %8 = arith.addf %6, %7 : vector<16x128xf32>
    %cst_5 = arith.constant 0.000000e+00 : f32
    %9 = vector.broadcast %cst_5 : f32 to vector<16x128xf32>
    %10 = arith.maximumf %3, %9 : vector<16x128xf32>
    %11 = arith.mulf %3, %8 : vector<16x128xf32>
    %12 = arith.subf %10, %11 : vector<16x128xf32>
    %13 = math.absf %3 : vector<16x128xf32>
    %cst_6 = arith.constant 0.000000e+00 : f32
    %14 = vector.broadcast %cst_6 : f32 to vector<16x128xf32>
    %15 = arith.subf %14, %13 : vector<16x128xf32>
    %16 = math.exp %15 : vector<16x128xf32>
    %17 = math.log1p %16 : vector<16x128xf32>
    %18 = arith.addf %12, %17 : vector<16x128xf32>
    %c0_7 = arith.constant 0 : index
    %c0_8 = arith.constant 0 : index
    %19 = vector.load %arg5[%c0_7, %c0_8] : memref<8x128xf32, #tpu.memory_space<vmem>>, vector<8x128xf32>
    %20 = vector.shape_cast %18 : vector<16x128xf32> to vector<2x8x128xf32>
    %cst_9 = arith.constant dense<0.000000e+00> : vector<8x128xf32>
    %21 = vector.multi_reduction <add>, %20, %cst_9 [0] : vector<2x8x128xf32> to vector<8x128xf32>
    %22 = arith.addf %19, %21 : vector<8x128xf32>
    %c0_10 = arith.constant 0 : index
    %c0_11 = arith.constant 0 : index
    %23 = vector.load %arg5[%c0_10, %c0_11] : memref<8x128xf32, #tpu.memory_space<vmem>>, vector<8x128xf32>
    tpu.vector_store %arg5[%c0_10, %c0_11], %22 {strides = array<i32>} : memref<8x128xf32, #tpu.memory_space<vmem>>, vector<8x128xf32>,
    %c0_i32_12 = arith.constant 0 : i32
    %24 = arith.cmpi eq, %arg1, %c0_i32_12 : i32
    %25 = arith.extui %24 : i1 to i32
    %c0_i32_13 = arith.constant 0 : i32
    %26 = arith.cmpi ne, %25, %c0_i32_13 : i32
    scf.if %26 {
      %c0_14 = arith.constant 0 : index
      %c0_15 = arith.constant 0 : index
      %27 = vector.load %arg5[%c0_14, %c0_15] : memref<8x128xf32, #tpu.memory_space<vmem>>, vector<8x128xf32>
      %28 = vector.shape_cast %27 : vector<8x128xf32> to vector<1x8x128xf32>
      %cst_16 = arith.constant dense<0.000000e+00> : vector<1xf32>
      %29 = vector.multi_reduction <add>, %28, %cst_16 [1, 2] : vector<1x8x128xf32> to vector<1xf32>
      %30 = vector.shape_cast %29 : vector<1xf32> to vector<1x1x1xf32>
      %31 = vector.extract %30[0, 0, 0] : f32 from vector<1x1x1xf32>
      %c0_17 = arith.constant 0 : index
      %c0_18 = arith.constant 0 : index
      %32 = memref.load %arg4[%c0_17, %c0_18] : memref<1x1xf32, #tpu.memory_space<smem>>
      memref.store %31, %arg4[%c0_17, %c0_18] : memref<1x1xf32, #tpu.memory_space<smem>>
    } else {
    }
    return
  }
  func.func @transform_0(%arg0: i32, %arg1: i32) -> (i32, i32) {
    %c1_i32 = arith.constant 1 : i32
    %0 = arith.muli %arg0, %c1_i32 : i32
    %1 = arith.addi %0, %arg1 : i32
    %c0_i32 = arith.constant 0 : i32
    %c0_i32_0 = arith.constant 0 : i32
    return %1, %c0_i32 : i32, i32
  }
  func.func @transform_1(%arg0: i32, %arg1: i32) -> (i32, i32) {
    %c1_i32 = arith.constant 1 : i32
    %0 = arith.muli %arg0, %c1_i32 : i32
    %1 = arith.addi %0, %arg1 : i32
    %c0_i32 = arith.constant 0 : i32
    %c0_i32_0 = arith.constant 0 : i32
    return %1, %c0_i32 : i32, i32
  }
  func.func @transform_2(%arg0: i32, %arg1: i32) -> (i32, i32) {
    %c0_i32 = arith.constant 0 : i32
    %c0_i32_0 = arith.constant 0 : i32
    return %arg0, %c0_i32 : i32, i32
  }
}

</mosaic_0001>

<bundles_post_ra>
// kernel: tpu_custom_call.1
= control target key start
LH: loop header
LB: loop body
LE: loop exit
PB: predicated region body
PF: predicated region fallthrough
CT: control target
= control target key end

     0   :  { %7 = vsyncpa [#allocation4], 0  ;;  %s264_s0 = inlined_call_operand.hbm [shape: f32[16,128], index: 0, kind: input, shape index: {}]   ;;  %s265_s1 = inlined_call_operand.hbm [shape: f32[16,128], index: 1, kind: input, shape index: {}]   ;;  %s266_s2 = inlined_call_operand.hbm [shape: f32[1,1], index: 2, kind: output, shape index: {}]  }
   0x1   :  { %8 = vsyncpa [#allocation7], 0 }
   0x2   :  { %9 = vsyncpa [#allocation5], 0  ;;  %s208_s9 = smov [#allocation3]   ;;  %s148_s13 = scalar_lea.hbm %s264_s0, 256 }
   0x3   :  { %s19_s10 = sshll.u32 %s208_s9, 4  ;;  %p149_p0 = scmp.ne.s32.totalorder %s264_s0, %s148_s13  ;;  %s20_s10 = int_to_ptr.vmem [resolvable:$true] %s19_s10 }
   0x4   :  { %p152_p1 = scmp.lt.u32.totalorder %s148_s13, %s264_s0 }
   0x6   :  { %p154_p2 = pnand %p152_p1, %p149_p0 }
   0x8   :  { %157 = shalt.err (!%p154_p2)
}
   0x9   :  { %s158_s18 = scalar_lea.vmem %s20_s10, 256  ;;  %p163_p4 = scmp.lt.s32.totalorder %s20_s10, %s20_s10 }
   0xa   :  { %p159_p3 = scmp.ne.s32.totalorder %s20_s10, %s158_s18  ;;  %p164_p5 = scmp.lt.s32.totalorder %s158_s18, %s158_s18 }
   0xc   :  { %p165_p6 = por %p164_p5, %p163_p4 }
   0xe   :  { %p166_p7 = pnand %p165_p6, %p159_p3 }
  0x10   :  { %169 = shalt.err (!%p166_p7)
}
  0x11   :  { %s209_s19 = smov 128   ;;  %s210_s20 = smov 8  }
  0x12   :  { %25 = dma.hbm_to_vmem [thread:$0]  %s264_s0, 256, %s20_s10, [#allocation4], %s209_s19, %s209_s19, %s210_s20  }
  0x13   :  { %s211_s23 = smov [#allocation6]   ;;  %s170_s27 = scalar_lea.hbm %s265_s1, 256 }
  0x14   :  { %s35_s24 = sshll.u32 %s211_s23, 4  ;;  %p171_p8 = scmp.ne.s32.totalorder %s265_s1, %s170_s27  ;;  %s36_s24 = int_to_ptr.vmem [resolvable:$true] %s35_s24 }
  0x15   :  { %p174_p9 = scmp.lt.u32.totalorder %s170_s27, %s265_s1 }
  0x17   :  { %p176_p10 = pnand %p174_p9, %p171_p8 }
  0x19   :  { %179 = shalt.err (!%p176_p10)
}
  0x1a   :  { %s180_s4 = scalar_lea.vmem %s36_s24, 256  ;;  %p185_p12 = scmp.lt.s32.totalorder %s36_s24, %s36_s24 }
  0x1b   :  { %p181_p11 = scmp.ne.s32.totalorder %s36_s24, %s180_s4  ;;  %p186_p13 = scmp.lt.s32.totalorder %s180_s4, %s180_s4 }
  0x1d   :  { %p187_p0 = por %p186_p13, %p185_p12 }
  0x1f   :  { %p188_p1 = pnand %p187_p0, %p181_p11 }
  0x21   :  { %191 = shalt.err (!%p188_p1)
}
  0x22   :  { %41 = dma.hbm_to_vmem [thread:$0]  %s265_s1, 256, %s36_s24, [#allocation7], %s209_s19, %s209_s19, %s210_s20  }
  0x23   :  { %202 = dma.done.wait [#allocation4], 256  }
  0x24   :  { %203 = vsyncadd [#allocation4], 4294967040 }
  0x25   :  { %204 = dma.done.wait [#allocation7], 256  }
  0x26   :  { %205 = vsyncadd [#allocation7], 4294967040  ;;  %v57_v0 = vld [vmem:[#allocation3] sm:$0xff]  ;;  %v58_v1 = vld [vmem:[#allocation3 + $0x8] sm:$0xff]  ;;  %s192_s8 = scalar_lea.hbm %s266_s2, 16 }
  0x27   :  { %v71_v2 = vand.u32 2147483647, %v57_v0  ;;  %v72_v3 = vand.u32 2147483647, %v58_v1  ;;  %v59_v8 = vld [vmem:[#allocation6] sm:$0xff]  ;;  %v60_v9 = vld [vmem:[#allocation6 + $0x8] sm:$0xff]  ;;  %p193_p2 = scmp.ne.s32.totalorder %s266_s2, %s192_s8  ;;  %p196_p3 = scmp.lt.u32.totalorder %s192_s8, %s266_s2 }
  0x28   :  { %v61_v12 = vmul.f32 0.9, %v59_v8  ;;  %v62_v14 = vmul.f32 0.9, %v60_v9  ;;  %v65_v21 = vmax.f32 %v57_v0, 0.0  ;;  %v66_v25 = vmax.f32 %v58_v1, 0.0 }
  0x29   :  { %v73_v4 = vsub.f32 0.0, %v71_v2  ;;  %v74_v5 = vsub.f32 0.0, %v72_v3  ;;  %p198_p4 = pnand %p196_p3, %p193_p2 }
  0x2a   :  { %v63_v17 = vadd.f32 0.05, %v61_v12  ;;  %v64_v19 = vadd.f32 0.05, %v62_v14 }
  0x2b   :  { %v75_v6 = vmul.f32 1.442695, %v73_v4  ;;  %v77_v7 = vmul.f32 1.442695, %v74_v5 }
  0x2c   :  { %v67_v22 = vmul.f32 %v63_v17, %v57_v0  ;;  %v68_v26 = vmul.f32 %v64_v19, %v58_v1 }
  0x2d   :  { %140 = vpow2.f32 %v75_v6 }
  0x2e   :  { %142 = vpow2.f32 %v77_v7  ;;  %v69_v30 = vsub.f32 %v65_v21, %v67_v22  ;;  %v70_v33 = vsub.f32 %v66_v25, %v68_v26 }
  0x37   :  { %v141_v10 = vpop.eup %140 }
  0x38   :  { %v143_v11 = vpop.eup %142  ;;  %v79_v13 = vadd.f32 1.0, %v141_v10  ;;  %v82_v16 = vmul.f32 -0.5, %v141_v10  ;;  %v85_v23 = vand.u32 2147483647, %v141_v10 }
  0x39   :  { %v88_v15 = vadd.f32 1.0, %v143_v11  ;;  %v91_v18 = vmul.f32 -0.5, %v143_v11  ;;  %v94_v27 = vand.u32 2147483647, %v143_v11 }
  0x3a   :  { %144 = vlog2.f32 %v79_v13  ;;  %v83_v20 = vadd.f32 1.0, %v82_v16  ;;  %vm86_vm0 = vcmp.lt.f32.partialorder %v85_v23, 0.0004427343 }
  0x3b   :  { %146 = vlog2.f32 %v88_v15  ;;  %v92_v24 = vadd.f32 1.0, %v91_v18  ;;  %vm95_vm1 = vcmp.lt.f32.partialorder %v94_v27, 0.0004427343 }
  0x3c   :  { %v84_v28 = vmul.f32 %v141_v10, %v83_v20 }
  0x3d   :  { %v93_v31 = vmul.f32 %v143_v11, %v92_v24 }
  0x44   :  { %v145_v29 = vpop.eup %144 }
  0x45   :  { %v147_v32 = vpop.eup %146  ;;  %v81_v34 = vmul.f32 0.6931472, %v145_v29 }
  0x46   :  { %v90_v35 = vmul.f32 0.6931472, %v147_v32 }
  0x47   :  { %v87_v36 = vsel %vm86_vm0, %v84_v28, %v81_v34 }
  0x48   :  { %v96_v37 = vsel %vm95_vm1, %v93_v31, %v90_v35  ;;  %v97_v38 = vadd.f32 %v87_v36, %v69_v30 }
  0x49   :  { %v98_v39 = vadd.f32 %v96_v37, %v70_v33 }
  0x4b   :  { %v100_v40 = vadd.f32 %v98_v39, %v97_v38 }
  0x4d   :  { %107 = vadd.xlane.f32.xlu0 %v100_v40 }
  0xda   :  { %v108_v41 = vpop.xlane.xlu0 %107 }
  0xdb   :  { %v109_v42 = vrot.slane %v108_v41, 4 }
  0xdd   :  { %v110_v43 = vadd.f32 %v109_v42, %v108_v41 }
  0xdf   :  { %v111_v44 = vrot.slane %v110_v43, 2 }
  0xe1   :  { %v112_v45 = vadd.f32 %v111_v44, %v110_v43 }
  0xe3   :  { %v113_v46 = vrot.slane %v112_v45, 1 }
  0xe5   :  { %v114_v47 = vadd.f32 %v113_v46, %v112_v45 }
  0xe7   :  { %133 = vpush %v114_v47 }
 0x118   :  { %s134_s1 = spop %133 }
 0x119   :  { %117 = sst [smem:[#allocation8]] %s134_s1 }
 0x11a   :  { %201 = shalt.err (!%p198_p4)
}
 0x11b   :  { %s212_s13 = smov [#allocation8]  }
 0x11c   :  { %125 = dma.smem_to_hbm %s212_s13, 16, %s266_s2, [#allocation5]  }
 0x11d   :  { %206 = dma.done.wait [#allocation5], 16  }
 0x11e   :  { %207 = vsyncadd [#allocation5], 4294967280 }
 0x11f   :  { %129 = sfence }
 0x120   :  { %130 = vsyncpa [#allocation4], 1 }
 0x121   :  { %131 = vsyncpa [#allocation7], 1 }
 0x122   :  { %132 = vsyncpa [#allocation5], 1 }

</bundles_post_ra>
